<compile_context>
chip_gen: v6e
topology: v6e:2x2x1
jax: 0.10.0
libtpu: 0.0.40
codegen_flags: <defaults>
</compile_context>

<pallas_src>
import functools

import jax
import jax.numpy as jnp
from jax.experimental import pallas as pl
from jax.experimental.pallas import tpu as pltpu


def _round_up(x, m):
    return ((x + m - 1) // m) * m


def _round_down(x, m):
    return (x // m) * m


def _vmem_capacity_bytes():
    try:
        return int(pltpu.get_tpu_info().vmem_capacity_bytes)
    except Exception:
        return 64 << 20  # v7x per-TensorCore VMEM — smallest current generation


def _combined_loss_kernel(logits_ref, labels_ref,
                          ce_ref, inter_ref, card_ref,
                          ce_acc, inter_acc, card_acc,
                          *, hw, ragged):
    t = pl.program_id(1)

    @pl.when(t == 0)
    def _():
        ce_acc[...] = jnp.zeros_like(ce_acc)
        inter_acc[...] = jnp.zeros_like(inter_acc)
        card_acc[...] = jnp.zeros_like(card_acc)

    x = logits_ref[0].astype(jnp.float32)            # (C, TILE)  classes on sublanes
    lab = labels_ref[0].astype(jnp.int32)            # (1, TILE)
    c, tile = x.shape

    # one-hot of the true class (classes on the sublane axis)
    cls_ids = jax.lax.broadcasted_iota(jnp.int32, (c, tile), 0)
    one_hot_b = cls_ids == lab                       # (C, TILE) bool

    if ragged:
        # Ragged last tile: fold the valid-pixel mask into one_hot (bool AND) and
        # use one NaN-safe select on probs below.  No mask code is emitted at all
        # when hw % tile == 0 (the common case).
        col = jax.lax.broadcasted_iota(jnp.int32, (1, tile), 1) + t * tile
        valid = col < hw                             # (1, TILE)
        one_hot = jnp.logical_and(one_hot_b, valid).astype(jnp.float32)
    else:
        one_hot = one_hot_b.astype(jnp.float32)

    # numerically-stable softmax / log-sum-exp along the class (sublane) axis
    m = jnp.max(x, axis=0, keepdims=True)            # (1, TILE)
    e = jnp.exp(x - m)                               # (C, TILE)
    se = jnp.sum(e, axis=0, keepdims=True)           # (1, TILE)
    lse = m + jnp.log(se)                            # (1, TILE)
    # pl.reciprocal routes off the VALU; keep exact (approx=True ~bf16 accuracy).
    probs = e * pl.reciprocal(se, approx=False)      # (C, TILE)
    if ragged:
        # select (NOT multiply-by-mask): garbage/NaN logits read past hw stay out.
        probs = jnp.where(valid, probs, 0.0)

    # cross-entropy per pixel: logsumexp - logit[true]
    true_logit = jnp.sum(x * one_hot, axis=0, keepdims=True)   # (1, TILE)
    ce_pix = lse - true_logit
    if ragged:
        ce_pix = jnp.where(valid, ce_pix, 0.0)

    # Per-step cross-lane reduce (XLU) into tiny accumulators — no (C, tile)
    # accumulator read-modify-write traffic on the vector load/store slots.
    ce_acc[...] += jnp.sum(ce_pix, axis=1, keepdims=True)            # (1, 1)
    inter_acc[...] += jnp.sum(probs * one_hot, axis=1, keepdims=True)  # (C, 1)
    card_acc[...] += jnp.sum(probs + one_hot, axis=1, keepdims=True)   # (C, 1)

    @pl.when(t == pl.num_programs(1) - 1)
    def _():
        ce_ref[...] = ce_acc[...][None]        # (1, 1, 1)
        inter_ref[...] = inter_acc[...][None]  # (1, C, 1)
        card_ref[...] = card_acc[...][None]    # (1, C, 1)


def combined_loss(logits, labels, *, smooth=1e-6, max_tile_hw=None):
    """logits: [B, C, H, W] float; labels: [B, H, W] int -> scalar loss."""
    B, C, H, W = logits.shape
    hw = H * W
    n_total = B * hw

    # Free reshapes — keep native NCHW layout (no HBM transpose copy).
    logits3d = logits.reshape(B, C, hw)
    labels3d = labels.reshape(B, 1, hw)   # keep producer dtype (int8/uint8/int32 all fine)

    logits_isz = jnp.dtype(logits.dtype).itemsize
    labels_isz = jnp.dtype(labels.dtype).itemsize

    # ---- tile selection: scale with C, budget against this generation's VMEM ----
    vmem_cap = _vmem_capacity_bytes()
    # Double-buffered input blocks dominate VMEM: 2 * tile * (C*logits_isz + labels_isz).
    per_pixel = 2 * (C * logits_isz + labels_isz)
    tile_vmem_cap = max(128, _round_down(vmem_cap // 4 // per_pixel, 128))
    # Target ~2 MiB of logits per grid step so the ~0.35us/step overhead amortizes.
    tile_target = max(128, _round_down((2 << 20) // max(1, C * logits_isz), 128))
    tile = min(tile_target, tile_vmem_cap, _round_up(hw, 128))
    if max_tile_hw is not None:
        tile = min(tile, max(128, _round_down(max_tile_hw, 128)))

    grid = (B, pl.cdiv(hw, tile))
    ragged = (hw % tile) != 0   # static: decides whether any mask code is emitted

    block_bytes = 2 * tile * (C * logits_isz + labels_isz)   # double-buffered inputs
    vmem_limit = int(min(vmem_cap * 9 // 10,
                         max(2 * block_bytes + (8 << 20), 32 << 20)))

    kernel = functools.partial(_combined_loss_kernel, hw=hw, ragged=ragged)

    ce_parts, inter_parts, card_parts = pl.pallas_call(
        kernel,
        out_shape=(
            jax.ShapeDtypeStruct((B, 1, 1), jnp.float32),   # per-b CE sum
            jax.ShapeDtypeStruct((B, C, 1), jnp.float32),   # per-b, per-class intersection
            jax.ShapeDtypeStruct((B, C, 1), jnp.float32),   # per-b, per-class cardinality
        ),
        grid_spec=pltpu.PrefetchScalarGridSpec(
            num_scalar_prefetch=0,
            grid=grid,
            in_specs=[
                pl.BlockSpec((1, C, tile), lambda b, t: (b, 0, t)),
                pl.BlockSpec((1, 1, tile), lambda b, t: (b, 0, t)),
            ],
            out_specs=(
                pl.BlockSpec((1, 1, 1), lambda b, t: (b, 0, 0)),
                pl.BlockSpec((1, C, 1), lambda b, t: (b, 0, 0)),
                pl.BlockSpec((1, C, 1), lambda b, t: (b, 0, 0)),
            ),
            scratch_shapes=[
                pltpu.VMEM((1, 1), jnp.float32),   # CE partial sum
                pltpu.VMEM((C, 1), jnp.float32),   # intersection partial sums
                pltpu.VMEM((C, 1), jnp.float32),   # cardinality partial sums
            ],
        ),
        compiler_params=pltpu.CompilerParams(
            dimension_semantics=("parallel", "arbitrary"),
            vmem_limit_bytes=vmem_limit),
    )(logits3d, labels3d)

    # Tiny final combine (outside the kernel so the batch axis can stay parallel).
    ce = jnp.sum(ce_parts) / jnp.float32(n_total)
    inter = jnp.sum(inter_parts[:, :, 0], axis=0)    # (C,)
    card = jnp.sum(card_parts[:, :, 0], axis=0)      # (C,)
    dice = (2.0 * inter + smooth) / (card + smooth)
    return ce + (1.0 - jnp.mean(dice))


def _reference_loss(logits, labels, smooth=1e-6):
    """Pure-JAX reference matching the PyTorch CombinedLoss module."""
    B, C, H, W = logits.shape
    x = jnp.transpose(logits, (0, 2, 3, 1)).reshape(-1, C).astype(jnp.float32)
    y = labels.reshape(-1)
    lse = jax.scipy.special.logsumexp(x, axis=1)
    ce = jnp.mean(lse - x[jnp.arange(x.shape[0]), y])
    probs = jax.nn.softmax(x, axis=1)
    one_hot = jax.nn.one_hot(y, C, dtype=jnp.float32)
    inter = jnp.sum(probs * one_hot, axis=0)
    card = jnp.sum(probs + one_hot, axis=0)
    dice = (2.0 * inter + smooth) / (card + smooth)
    return ce + (1.0 - jnp.mean(dice))


if __name__ == "__main__":
    key = jax.random.PRNGKey(0)
    k1, k2, k3, k4 = jax.random.split(key, 4)

    # Primary check: even hw, single lane-dense tile (same shapes as the module spec).
    B, C, H, W = 2, 4, 16, 16
    logits = jax.random.normal(k1, (B, C, H, W), dtype=jnp.float32)
    labels = jax.random.randint(k2, (B, H, W), 0, C, dtype=jnp.int32)
    loss = jax.block_until_ready(combined_loss(logits, labels))
    ref = _reference_loss(logits, labels)
    assert jnp.allclose(loss, ref, atol=1e-5, rtol=1e-5), (loss, ref)

    # Ragged / multi-tile check: hw=320 with a forced 128-pixel tile exercises the
    # masked partial last tile and cross-step accumulation on real hardware.
    H2, W2 = 16, 20
    logits2 = jax.random.normal(k3, (B, C, H2, W2), dtype=jnp.float32)
    labels2 = jax.random.randint(k4, (B, H2, W2), 0, C, dtype=jnp.int32)
    loss2 = jax.block_until_ready(combined_loss(logits2, labels2, max_tile_hw=128))
    ref2 = _reference_loss(logits2, labels2)
    assert jnp.allclose(loss2, ref2, atol=1e-5, rtol=1e-5), (loss2, ref2)

    print("KERNEL_OK")
</pallas_src>

<mosaic_0001>
module attributes {stable_mosaic.version = 11 : i64} {
  func.func @_combined_loss_kernel(%arg0: i32, %arg1: i32, %arg2: memref<1x4x256xf32, #tpu.memory_space<vmem>>, %arg3: memref<1x1x256xi32, #tpu.memory_space<vmem>>, %arg4: memref<1x1x1xf32, #tpu.memory_space<vmem>>, %arg5: memref<1x4x1xf32, #tpu.memory_space<vmem>>, %arg6: memref<1x4x1xf32, #tpu.memory_space<vmem>>, %arg7: memref<1x1xf32, #tpu.memory_space<vmem>>, %arg8: memref<4x1xf32, #tpu.memory_space<vmem>>, %arg9: memref<4x1xf32, #tpu.memory_space<vmem>>) attributes {dimension_semantics = [#tpu.dimension_semantics<parallel>, #tpu.dimension_semantics<arbitrary>], iteration_bounds = array<i64: 2, 1>, scalar_prefetch = 0 : i64, scratch_operands = 3 : i64, tpu.core_type = #tpu.core_type<tc>, window_params = [{transform_indices = @transform_0, window_bounds = array<i64: 1, 4, 256>}, {transform_indices = @transform_1, window_bounds = array<i64: 1, 1, 256>}, {transform_indices = @transform_2, window_bounds = array<i64: 1, 1, 1>}, {transform_indices = @transform_3, window_bounds = array<i64: 1, 4, 1>}, {transform_indices = @transform_4, window_bounds = array<i64: 1, 4, 1>}]} {
    %c0_i32 = arith.constant 0 : i32
    %0 = arith.cmpi eq, %arg1, %c0_i32 : i32
    %1 = arith.extui %0 : i1 to i32
    %c0_i32_0 = arith.constant 0 : i32
    %2 = arith.cmpi ne, %1, %c0_i32_0 : i32
    scf.if %2 {
      %cst_25 = arith.constant 0.000000e+00 : f32
      %48 = vector.broadcast %cst_25 : f32 to vector<1x1xf32>
      %c0_26 = arith.constant 0 : index
      %c0_27 = arith.constant 0 : index
      %49 = vector.load %arg7[%c0_26, %c0_27] : memref<1x1xf32, #tpu.memory_space<vmem>>, vector<1x1xf32>
      tpu.vector_store %arg7[%c0_26, %c0_27], %48 {strides = array<i32>} : memref<1x1xf32, #tpu.memory_space<vmem>>, vector<1x1xf32>,
      %cst_28 = arith.constant 0.000000e+00 : f32
      %50 = vector.broadcast %cst_28 : f32 to vector<4x1xf32>
      %c0_29 = arith.constant 0 : index
      %c0_30 = arith.constant 0 : index
      %51 = vector.load %arg8[%c0_29, %c0_30] : memref<4x1xf32, #tpu.memory_space<vmem>>, vector<4x1xf32>
      tpu.vector_store %arg8[%c0_29, %c0_30], %50 {strides = array<i32>} : memref<4x1xf32, #tpu.memory_space<vmem>>, vector<4x1xf32>,
      %cst_31 = arith.constant 0.000000e+00 : f32
      %52 = vector.broadcast %cst_31 : f32 to vector<4x1xf32>
      %c0_32 = arith.constant 0 : index
      %c0_33 = arith.constant 0 : index
      %53 = vector.load %arg9[%c0_32, %c0_33] : memref<4x1xf32, #tpu.memory_space<vmem>>, vector<4x1xf32>
      tpu.vector_store %arg9[%c0_32, %c0_33], %52 {strides = array<i32>} : memref<4x1xf32, #tpu.memory_space<vmem>>, vector<4x1xf32>,
    } else {
    }
    %c0 = arith.constant 0 : index
    %c0_1 = arith.constant 0 : index
    %c0_2 = arith.constant 0 : index
    %3 = vector.load %arg2[%c0, %c0_1, %c0_2] : memref<1x4x256xf32, #tpu.memory_space<vmem>>, vector<1x4x256xf32>
    %4 = vector.shape_cast %3 : vector<1x4x256xf32> to vector<4x256xf32>
    %c0_3 = arith.constant 0 : index
    %c0_4 = arith.constant 0 : index
    %c0_5 = arith.constant 0 : index
    %5 = vector.load %arg3[%c0_3, %c0_4, %c0_5] : memref<1x1x256xi32, #tpu.memory_space<vmem>>, vector<1x1x256xi32>
    %6 = vector.shape_cast %5 : vector<1x1x256xi32> to vector<1x256xi32>
    %7 = tpu.iota {dimensions = array<i32: 0>} : vector<4x256xi32>
    %8 = vector.broadcast %6 : vector<1x256xi32> to vector<4x256xi32>
    %9 = arith.cmpi eq, %7, %8 : vector<4x256xi32>
    %10 = arith.extui %9 : vector<4x256xi1> to vector<4x256xi32>
    %11 = arith.sitofp %10 : vector<4x256xi32> to vector<4x256xf32>
    %cst = arith.constant dense<0xFF800000> : vector<256xf32>
    %12 = vector.multi_reduction <maximumf>, %4, %cst [0] : vector<4x256xf32> to vector<256xf32>
    %13 = vector.shape_cast %12 : vector<256xf32> to vector<1x256xf32>
    %14 = vector.broadcast %13 : vector<1x256xf32> to vector<4x256xf32>
    %15 = arith.subf %4, %14 : vector<4x256xf32>
    %16 = math.exp %15 : vector<4x256xf32>
    %cst_6 = arith.constant dense<0.000000e+00> : vector<256xf32>
    %17 = vector.multi_reduction <add>, %16, %cst_6 [0] : vector<4x256xf32> to vector<256xf32>
    %18 = vector.shape_cast %17 : vector<256xf32> to vector<1x256xf32>
    %19 = math.log %18 : vector<1x256xf32>
    %20 = arith.addf %13, %19 : vector<1x256xf32>
    %21 = tpu.reciprocal %18 : vector<1x256xf32> -> vector<1x256xf32>
    %22 = vector.broadcast %21 : vector<1x256xf32> to vector<4x256xf32>
    %23 = arith.mulf %16, %22 : vector<4x256xf32>
    %24 = arith.mulf %4, %11 : vector<4x256xf32>
    %cst_7 = arith.constant dense<0.000000e+00> : vector<256xf32>
    %25 = vector.multi_reduction <add>, %24, %cst_7 [0] : vector<4x256xf32> to vector<256xf32>
    %26 = vector.shape_cast %25 : vector<256xf32> to vector<1x256xf32>
    %27 = arith.subf %20, %26 : vector<1x256xf32>
    %c0_8 = arith.constant 0 : index
    %c0_9 = arith.constant 0 : index
    %28 = vector.load %arg7[%c0_8, %c0_9] : memref<1x1xf32, #tpu.memory_space<vmem>>, vector<1x1xf32>
    %cst_10 = arith.constant dense<0.000000e+00> : vector<1xf32>
    %29 = vector.multi_reduction <add>, %27, %cst_10 [1] : vector<1x256xf32> to vector<1xf32>
    %30 = vector.shape_cast %29 : vector<1xf32> to vector<1x1xf32>
    %31 = arith.addf %28, %30 : vector<1x1xf32>
    %c0_11 = arith.constant 0 : index
    %c0_12 = arith.constant 0 : index
    %32 = vector.load %arg7[%c0_11, %c0_12] : memref<1x1xf32, #tpu.memory_space<vmem>>, vector<1x1xf32>
    tpu.vector_store %arg7[%c0_11, %c0_12], %31 {strides = array<i32>} : memref<1x1xf32, #tpu.memory_space<vmem>>, vector<1x1xf32>,
    %c0_13 = arith.constant 0 : index
    %c0_14 = arith.constant 0 : index
    %33 = vector.load %arg8[%c0_13, %c0_14] : memref<4x1xf32, #tpu.memory_space<vmem>>, vector<4x1xf32>
    %34 = arith.mulf %23, %11 : vector<4x256xf32>
    %cst_15 = arith.constant dense<0.000000e+00> : vector<4xf32>
    %35 = vector.multi_reduction <add>, %34, %cst_15 [1] : vector<4x256xf32> to vector<4xf32>
    %36 = vector.shape_cast %35 : vector<4xf32> to vector<4x1xf32>
    %37 = arith.addf %33, %36 : vector<4x1xf32>
    %c0_16 = arith.constant 0 : index
    %c0_17 = arith.constant 0 : index
    %38 = vector.load %arg8[%c0_16, %c0_17] : memref<4x1xf32, #tpu.memory_space<vmem>>, vector<4x1xf32>
    tpu.vector_store %arg8[%c0_16, %c0_17], %37 {strides = array<i32>} : memref<4x1xf32, #tpu.memory_space<vmem>>, vector<4x1xf32>,
    %c0_18 = arith.constant 0 : index
    %c0_19 = arith.constant 0 : index
    %39 = vector.load %arg9[%c0_18, %c0_19] : memref<4x1xf32, #tpu.memory_space<vmem>>, vector<4x1xf32>
    %40 = arith.addf %23, %11 : vector<4x256xf32>
    %cst_20 = arith.constant dense<0.000000e+00> : vector<4xf32>
    %41 = vector.multi_reduction <add>, %40, %cst_20 [1] : vector<4x256xf32> to vector<4xf32>
    %42 = vector.shape_cast %41 : vector<4xf32> to vector<4x1xf32>
    %43 = arith.addf %39, %42 : vector<4x1xf32>
    %c0_21 = arith.constant 0 : index
    %c0_22 = arith.constant 0 : index
    %44 = vector.load %arg9[%c0_21, %c0_22] : memref<4x1xf32, #tpu.memory_space<vmem>>, vector<4x1xf32>
    tpu.vector_store %arg9[%c0_21, %c0_22], %43 {strides = array<i32>} : memref<4x1xf32, #tpu.memory_space<vmem>>, vector<4x1xf32>,
    %c0_i32_23 = arith.constant 0 : i32
    %45 = arith.cmpi eq, %arg1, %c0_i32_23 : i32
    %46 = arith.extui %45 : i1 to i32
    %c0_i32_24 = arith.constant 0 : i32
    %47 = arith.cmpi ne, %46, %c0_i32_24 : i32
    scf.if %47 {
      %c0_25 = arith.constant 0 : index
      %c0_26 = arith.constant 0 : index
      %48 = vector.load %arg7[%c0_25, %c0_26] : memref<1x1xf32, #tpu.memory_space<vmem>>, vector<1x1xf32>
      %49 = vector.shape_cast %48 : vector<1x1xf32> to vector<1x1x1xf32>
      %c0_27 = arith.constant 0 : index
      %c0_28 = arith.constant 0 : index
      %c0_29 = arith.constant 0 : index
      %50 = vector.load %arg4[%c0_27, %c0_28, %c0_29] : memref<1x1x1xf32, #tpu.memory_space<vmem>>, vector<1x1x1xf32>
      tpu.vector_store %arg4[%c0_27, %c0_28, %c0_29], %49 {strides = array<i32>} : memref<1x1x1xf32, #tpu.memory_space<vmem>>, vector<1x1x1xf32>,
      %c0_30 = arith.constant 0 : index
      %c0_31 = arith.constant 0 : index
      %51 = vector.load %arg8[%c0_30, %c0_31] : memref<4x1xf32, #tpu.memory_space<vmem>>, vector<4x1xf32>
      %52 = vector.shape_cast %51 : vector<4x1xf32> to vector<1x4x1xf32>
      %c0_32 = arith.constant 0 : index
      %c0_33 = arith.constant 0 : index
      %c0_34 = arith.constant 0 : index
      %53 = vector.load %arg5[%c0_32, %c0_33, %c0_34] : memref<1x4x1xf32, #tpu.memory_space<vmem>>, vector<1x4x1xf32>
      tpu.vector_store %arg5[%c0_32, %c0_33, %c0_34], %52 {strides = array<i32>} : memref<1x4x1xf32, #tpu.memory_space<vmem>>, vector<1x4x1xf32>,
      %c0_35 = arith.constant 0 : index
      %c0_36 = arith.constant 0 : index
      %54 = vector.load %arg9[%c0_35, %c0_36] : memref<4x1xf32, #tpu.memory_space<vmem>>, vector<4x1xf32>
      %55 = vector.shape_cast %54 : vector<4x1xf32> to vector<1x4x1xf32>
      %c0_37 = arith.constant 0 : index
      %c0_38 = arith.constant 0 : index
      %c0_39 = arith.constant 0 : index
      %56 = vector.load %arg6[%c0_37, %c0_38, %c0_39] : memref<1x4x1xf32, #tpu.memory_space<vmem>>, vector<1x4x1xf32>
      tpu.vector_store %arg6[%c0_37, %c0_38, %c0_39], %55 {strides = array<i32>} : memref<1x4x1xf32, #tpu.memory_space<vmem>>, vector<1x4x1xf32>,
    } else {
    }
    return
  }
  func.func @transform_0(%arg0: i32, %arg1: i32) -> (i32, i32, i32) {
    %c0_i32 = arith.constant 0 : i32
    %c0_i32_0 = arith.constant 0 : i32
    return %arg0, %c0_i32, %arg1 : i32, i32, i32
  }
  func.func @transform_1(%arg0: i32, %arg1: i32) -> (i32, i32, i32) {
    %c0_i32 = arith.constant 0 : i32
    %c0_i32_0 = arith.constant 0 : i32
    return %arg0, %c0_i32, %arg1 : i32, i32, i32
  }
  func.func @transform_2(%arg0: i32, %arg1: i32) -> (i32, i32, i32) {
    %c0_i32 = arith.constant 0 : i32
    %c0_i32_0 = arith.constant 0 : i32
    %c0_i32_1 = arith.constant 0 : i32
    return %arg0, %c0_i32, %c0_i32_0 : i32, i32, i32
  }
  func.func @transform_3(%arg0: i32, %arg1: i32) -> (i32, i32, i32) {
    %c0_i32 = arith.constant 0 : i32
    %c0_i32_0 = arith.constant 0 : i32
    %c0_i32_1 = arith.constant 0 : i32
    return %arg0, %c0_i32, %c0_i32_0 : i32, i32, i32
  }
  func.func @transform_4(%arg0: i32, %arg1: i32) -> (i32, i32, i32) {
    %c0_i32 = arith.constant 0 : i32
    %c0_i32_0 = arith.constant 0 : i32
    %c0_i32_1 = arith.constant 0 : i32
    return %arg0, %c0_i32, %c0_i32_0 : i32, i32, i32
  }
}

</mosaic_0001>

<bundles_post_ra>
// kernel: tpu_custom_call.1
= control target key start
LH: loop header
LB: loop body
LE: loop exit
PB: predicated region body
PF: predicated region fallthrough
CT: control target
= control target key end

     0   :  { %10 = vsyncpa [#allocation6], 0  ;;  %s989_s0 = inlined_call_operand.hbm [shape: f32[2,4,256], index: 0, kind: input, shape index: {}]   ;;  %s990_s1 = inlined_call_operand.hbm [shape: s32[2,1,256], index: 1, kind: input, shape index: {}]   ;;  %s991_s2 = inlined_call_operand.vmem [shape: f32[2,1,1], index: 2, kind: output, shape index: {0}]   ;;  %s992_s3 = inlined_call_operand.vmem [shape: f32[2,4,1], index: 3, kind: output, shape index: {1}]   ;;  %s993_s4 = inlined_call_operand.vmem [shape: f32[2,4,1], index: 4, kind: output, shape index: {2}]  }
   0x1   :  { %12 = vsyncpa [#allocation6 + $0x1], 0 }
   0x2   :  { %13 = vsyncpa [#allocation8], 0 }
   0x3   :  { %15 = vsyncpa [#allocation8 + $0x1], 0  ;;  %s831_s15 = smov 0   ;;  %s833_s16 = smov 0  }
   0x4   :  { %s835_s17 = smov 0   ;;  %s837_s18 = smov 0  }
   0x5   :  { %s839_s19 = smov 0   ;;  %s841_s20 = smov 0  }
   0x6 LB: > { %s598_s21 = sadd.s32 4294967295, %s801_s20   ;;  %s33_s22 = sadd.s32 1, %s797_s19  ;;  %s801_s20 = sphi %s841_s20, %s21_s20   ;;  %s797_s19 = sphi %s839_s19, %s1002_s19   ;;  %s793_s18 = sphi %s837_s18, %s1001_s18   ;;  %s789_s17 = sphi %s835_s17, %s1000_s17   ;;  %s785_s16 = sphi %s833_s16, %s999_s16   ;;  %s781_s15 = sphi %s831_s15, %s998_s15  }
   0x7   : > { %p35_p0 = scmp.ge.s32.totalorder %s33_s22, 2  ;;  %s42_s23 = sadd.s32 1, %s789_s17 }
   0x8   : > { %p49_p1 = scmp.ne.s32.totalorder %s789_s17, %s785_s16  ;;  %p50_p2 = scmp.eq.s32.totalorder %s801_s20, 0 }
   0x9   : > { %s1004_s22 = smov (%p35_p0, %s33_s22), 0  ;;  %p55_p4 = scmp.ne.s32.totalorder %s785_s16, %s781_s15 }
   0xa   : > { %p867_p3 = por %p50_p2, %p49_p1  ;;  %s37_s25 = ssub.s32 %s797_s19, %s1004_s22 }
   0xb   : > { %p56_p5 = scmp.eq.s32.totalorder %s598_s21, 0  ;;  %p40_p6 = scmp.eq.s32.totalorder %s37_s25, 0 }
   0xc   : > { %p630_p8 = scmp.lt.s32.totalorder %s801_s20, 2  ;;  %s883_s28 = sand.u32 1, %s789_s17  }
   0xd   : > { %p874_p7 = por %p56_p5, %p55_p4  ;;  %s617_s29 = sshll.u32 %s797_s19, 7 }
   0xe   : > { %s880_s27 = scalar_select %p40_p6, %s789_s17, %s42_s23  }
   0xf   : > { %s602_s30 = sshll.u32 %s883_s28, 3  ;;  %s197_s7 = scalar_lea.hbm %s989_s0, %s617_s29 }
  0x10   : > { %s189_s8 = scalar_lea.vmem [#allocation5], %s602_s30  ;;  %p892_p9 = pnand %p630_p8, %p867_p3 }
  0x11   : > { %s199_s9 = sshll.u32 %s189_s8, 4  ;;  %p608_p10 = scmp.ge.s32.totalorder %s801_s20, 1  ;;  %s200_s9 = int_to_ptr.vmem [resolvable:$true] %s199_s9 }
  0x12   : > { %p225_p11 = scmp.lt.s32.totalorder %s801_s20, 3  ;;  %s186_s11 = scalar_lea.sflag [#allocation6], %s883_s28 }
  0x13   : > { %p693_p12 = pneg %p892_p9  ;;  %s704_s12 = scalar_lea.vmem %s200_s9, 128 }
  0x14   : > { %p705_p13 = scmp.ne.s32.totalorder %s200_s9, %s704_s12  ;;  %s803_s13 = smov [#allocation5]  }
  0x15   : > { %s709_s14 = sshll.u32 %s803_s13, 4  ;;  %s710_s14 = int_to_ptr.vmem [resolvable:$false] %s709_s14 }
  0x16   : > { %p707_p0 = pnand %p705_p13, %p693_p12  ;;  %s711_s15 = scalar_lea.vmem %s710_s14, 256 }
  0x17   : > { %p712_p2 = scmp.lt.s32.totalorder %s200_s9, %s710_s14  ;;  %p713_p3 = scmp.lt.s32.totalorder %s711_s15, %s704_s12 }
  0x18   : > { %p708_p1 = pneg %p707_p0 }
  0x19   : > { %p714_p4 = por %p713_p3, %p712_p2 }
  0x1b   : > { %p715_p5 = pnand %p714_p4, %p708_p1 }
  0x1d   : > { %718 = shalt.err (!%p715_p5)
}
  0x1e   : > { %626 = dma.hbm_to_vmem [thread:$0]  (!%p892_p9), %s197_s7, 128, %s200_s9, %s186_s11  }
  0x1f   : > { %p910_p6 = pnand %p608_p10, %p225_p11  ;;  %s605_s23 = sshll.u32 %s883_s28, 1 }
  0x20   : > { %s618_s24 = sshll.u32 %s797_s19, 5  ;;  %s210_s5 = scalar_lea.vmem [#allocation7], %s605_s23 }
  0x21   : > { %s218_s30 = scalar_lea.hbm %s990_s1, %s618_s24  ;;  %s220_s6 = sshll.u32 %s210_s5, 4  ;;  %s221_s6 = int_to_ptr.vmem [resolvable:$true] %s220_s6 }
  0x22   : > { %s207_s8 = scalar_lea.sflag [#allocation8], %s883_s28  ;;  %s732_s12 = scalar_lea.vmem %s221_s6, 32 }
  0x23   : > { %p733_p8 = scmp.ne.s32.totalorder %s221_s6, %s732_s12  ;;  %s804_s7 = smov [#allocation7]  }
  0x24   : > { %s737_s9 = sshll.u32 %s804_s7, 4  ;;  %s738_s9 = int_to_ptr.vmem [resolvable:$false] %s737_s9 }
  0x25   : > { %p735_p13 = pnand %p733_p8, %p693_p12  ;;  %s739_s11 = scalar_lea.vmem %s738_s9, 64 }
  0x26   : > { %p740_p10 = scmp.lt.s32.totalorder %s221_s6, %s738_s9  ;;  %p741_p11 = scmp.lt.s32.totalorder %s739_s11, %s732_s12 }
  0x27   : > { %p736_p0 = pneg %p735_p13 }
  0x28   : > { %p742_p1 = por %p741_p11, %p740_p10 }
  0x2a   : > { %p743_p2 = pnand %p742_p1, %p736_p0 }
  0x2c   : > { %746 = shalt.err (!%p743_p2)
}
  0x2d   : > { %629 = dma.hbm_to_vmem [thread:$0]  (!%p892_p9), %s218_s30, 32, %s221_s6, %s207_s8  }
  0x2e   : > { %229 = sbr.rel (%p910_p6) target bundleno = 281 (0x119), region = 28  ;;  %s231_s28 = sand.u32 (!%p910_p6), 1, %s785_s16  }
  0x2f   : > { %s609_s13 = sshll.u32 (!%p910_p6), %s231_s28, 3  ;;  %s232_s14 = scalar_lea.sflag (!%p910_p6), [#allocation6], %s231_s28 }
  0x30   : > { %s235_s15 = scalar_lea.vmem (!%p910_p6), [#allocation5], %s609_s13 }
  0x33   : > { %772 = dma.done.wait (%p874_p7), %s232_s14, 128  }
  0x34   : > { %774 = vsyncadd (%p874_p7), %s232_s14, 4294967168  ;;  %s610_s23 = sshll.u32 %s231_s28, 1  ;;  %s241_s24 = scalar_lea.sflag [#allocation8], %s231_s28 }
  0x35   : > { %s244_s25 = scalar_lea.vmem [#allocation7], %s610_s23 }
  0x36   : > { %776 = dma.done.wait (%p874_p7), %s241_s24, 32  }
  0x37   : > { %778 = vsyncadd (%p874_p7), %s241_s24, 4294967264  ;;  %vm297_vm0 = vcmask 0   ;;  %v805_v0 = vmov 0.0   ;;  %vm323_vm1 = vcmask 1043456   ;;  %v302_v1 = vld [vmem:[%s235_s15] sm:$0xff]  ;;  %v304_v10 = vlaneseq  ;;  %p282_p7 = scmp.lt.s32.totalorder %s793_s18, 1 }
  0x38   : > { %298 = vst.msk [vmem:[#allocation2] sm:$0x1] %vm297_vm0, %v805_v0  ;;  %v321_v2 = vcombine.high %v302_v1, %v302_v1  ;;  %v324_v3 = vsel %vm323_vm1, %v302_v1, -inf  ;;  %v303_v22 = vld [vmem:[%s244_s25] sm:$0x3]  ;;  %vm299_vm4 = vcmask 3072  }
  0x39   : > { %v325_v4 = vrot.slane %v324_v3, 4  ;;  %v305_v15 = vshrl.u32 %v304_v10, 7  ;;  %301 = vst.msk [vmem:[#allocation4] sm:$0xf] %vm299_vm4, %v805_v0  ;;  %300 = vst.msk [vmem:[#allocation3] sm:$0xf] %vm299_vm4, %v805_v0 }
  0x3a   : > { %v331_v5 = vsel %vm323_vm1, %v321_v2, -inf  ;;  %s1006_s18 = smov (!%p282_p7, %s793_s18), 1 }
  0x3b   : > { %v326_v6 = vmax.f32 %v324_v3, %v325_v4  ;;  %v332_v7 = vrot.slane %v331_v5, 4  ;;  %v308_v19 = vsub.s32 0, %v305_v15  ;;  %v312_v20 = vsub.s32 1, %v305_v15  ;;  %s284_s21 = scalar_lea.vmem %s991_s2, %s1006_s18  ;;  %s611_s29 = sshll.u32 %s1006_s18, 2 }
  0x3c   : > { %s288_s6 = scalar_lea.vmem %s992_s3, %s611_s29  ;;  %s292_s7 = scalar_lea.vmem %s993_s4, %s611_s29 }
  0x3d   : > { %v327_v8 = vrot.slane %v326_v6, 2  ;;  %v333_v9 = vmax.f32 %v331_v5, %v332_v7  ;;  %v309_v24 = vrot.slane %v303_v22, %v308_v19  ;;  %v313_v25 = vrot.slane %v303_v22, %v312_v20 }
  0x3f   : > { %v328_v11 = vmax.f32 %v326_v6, %v327_v8  ;;  %v334_v12 = vrot.slane %v333_v9, 2  ;;  %vm314_vm2 = vcmp.eq.s32.totalorder %v305_v15, %v309_v24  ;;  %vm315_vm3 = vcmp.eq.s32.totalorder %v305_v15, %v313_v25  ;;  %v399_v22 = vld [vmem:[#allocation2] sm:$0x1] }
  0x40   : > { %v613_v27 = vsel %vm314_vm2, 1.0, %v805_v0  ;;  %v614_v28 = vsel %vm315_vm3, 1.0, %v805_v0  ;;  %v419_v25 = vld [vmem:[#allocation4] sm:$0xf] }
  0x41   : > { %v329_v13 = vrot.slane %v328_v11, 1  ;;  %v335_v14 = vmax.f32 %v333_v9, %v334_v12  ;;  %v377_v29 = vcombine.low %v613_v27, %v614_v28 }
  0x43   : > { %v330_v16 = vmax.f32 %v328_v11, %v329_v13  ;;  %v336_v17 = vrot.slane %v335_v14, 1  ;;  %v379_v30 = vmul.f32 %v377_v29, %v302_v1 }
  0x45   : > { %v337_v18 = vmax.f32 %v335_v14, %v336_v17  ;;  %v381_v36 = vcombine.high %v379_v30, %v379_v30  ;;  %v383_v39 = vsel %vm323_vm1, %v379_v30, 0.0 }
  0x46   : > { %v384_v45 = vrot.slane %v383_v39, 4 }
  0x47   : > { %v340_v21 = vcombine.low %v330_v16, %v337_v18  ;;  %v390_v42 = vsel %vm323_vm1, %v381_v36, 0.0 }
  0x48   : > { %v391_v48 = vrot.slane %v390_v42, 4  ;;  %v385_v51 = vadd.f32 %v384_v45, %v383_v39 }
  0x49   : > { %v342_v23 = vsub.f32 %v302_v1, %v340_v21 }
  0x4a   : > { %v392_v53 = vadd.f32 %v391_v48, %v390_v42  ;;  %v386_v54 = vrot.slane %v385_v51, 2 }
  0x4b   : > { %v343_v26 = vmul.f32 1.442695, %v342_v23 }
  0x4c   : > { %v393_v55 = vrot.slane %v392_v53, 2  ;;  %v387_v56 = vadd.f32 %v386_v54, %v385_v51 }
  0x4d   : > { %681 = vpow2.f32 %v343_v26  ;;  %v406_v26 = vld [vmem:[#allocation3] sm:$0xf] }
  0x4e   : > { %v394_v57 = vadd.f32 %v393_v55, %v392_v53  ;;  %v388_v58 = vrot.slane %v387_v56, 1 }
  0x50   : > { %v395_v59 = vrot.slane %v394_v57, 1  ;;  %v389_v63 = vadd.f32 %v388_v58, %v387_v56 }
  0x52   : > { %v396_v5 = vadd.f32 %v395_v59, %v394_v57 }
  0x5a   : > { %v682_v31 = vpop.eup %681 }
  0x5b   : > { %v346_v32 = vcombine.high %v682_v31, %v682_v31  ;;  %v348_v33 = vsel %vm323_vm1, %v682_v31, 0.0 }
  0x5c   : > { %v349_v34 = vrot.slane %v348_v33, 4 }
  0x5d   : > { %v355_v35 = vsel %vm323_vm1, %v346_v32, 0.0 }
  0x5e   : > { %v350_v37 = vadd.f32 %v349_v34, %v348_v33  ;;  %v356_v38 = vrot.slane %v355_v35, 4 }
  0x60   : > { %v351_v40 = vrot.slane %v350_v37, 2  ;;  %v357_v41 = vadd.f32 %v356_v38, %v355_v35 }
  0x62   : > { %v352_v43 = vadd.f32 %v351_v40, %v350_v37  ;;  %v358_v44 = vrot.slane %v357_v41, 2 }
  0x64   : > { %v353_v46 = vrot.slane %v352_v43, 1  ;;  %v359_v47 = vadd.f32 %v358_v44, %v357_v41 }
  0x66   : > { %v354_v49 = vadd.f32 %v353_v46, %v352_v43  ;;  %v360_v50 = vrot.slane %v359_v47, 1 }
  0x68   : > { %v361_v52 = vadd.f32 %v360_v50, %v359_v47  ;;  %683 = vlog2.f32 %v354_v49 }
  0x69   : > { %685 = vrcp.f32 %v354_v49 }
  0x6a   : > { %687 = vlog2.f32 %v361_v52 }
  0x6b   : > { %689 = vrcp.f32 %v361_v52 }
  0x75   : > { %v684_v60 = vpop.eup %683 }
  0x76   : > { %v686_v61 = vpop.eup %685  ;;  %v363_v62 = vmul.f32 0.6931472, %v684_v60 }
  0x77   : > { %v688_v1 = vpop.eup %687 }
  0x78   : > { %v690_v2 = vpop.eup %689  ;;  %v365_v3 = vmul.f32 0.6931472, %v688_v1  ;;  %v366_v4 = vadd.f32 %v363_v62, %v330_v16 }
  0x79   : > { %v372_v6 = vcombine.low %v686_v61, %v690_v2 }
  0x7a   : > { %v367_v7 = vadd.f32 %v365_v3, %v337_v18  ;;  %v397_v8 = vsub.f32 %v366_v4, %v389_v63 }
  0x7b   : > { %v374_v9 = vmul.f32 %v682_v31, %v372_v6 }
  0x7c   : > { %v398_v10 = vsub.f32 %v367_v7, %v396_v5 }
  0x7d   : > { %v420_v11 = vadd.f32 %v377_v29, %v374_v9  ;;  %v407_v12 = vmul.f32 %v377_v29, %v374_v9 }
  0x7e   : > { %v400_v13 = vadd.f32 %v398_v10, %v397_v8 }
  0x7f   : > { %v422_v14 = vcombine.high %v420_v11, %v420_v11  ;;  %v424_v15 = vsel %vm323_vm1, %v420_v11, 0.0  ;;  %v409_v17 = vcombine.high %v407_v12, %v407_v12  ;;  %v411_v19 = vsel %vm323_vm1, %v407_v12, 0.0 }
  0x80   : > { %401 = vadd.xlane.f32.xlu0 %v400_v13 }
  0x81   : > { %v425_v20 = vsel %vm323_vm1, %v422_v14, 0.0  ;;  %v412_v16 = vsel %vm323_vm1, %v409_v17, 0.0 }
  0x82   : > { %v426_v18 = vadd.f32 %v425_v20, %v424_v15  ;;  %v413_v21 = vadd.f32 %v412_v16, %v411_v19 }
  0x84   : > { %427 = vadd.xlane.f32.xlu1 %v426_v18  ;;  %414 = vadd.xlane.f32.xlu0 %v413_v21 }
 0x109   : > { %v402_v23 = vpop.xlane.xlu0 %401 }
 0x10a   : > { %v403_v24 = vadd.f32 %v402_v23, %v399_v22 }
 0x10c   : > { %405 = vst.msk [vmem:[#allocation2] sm:$0x1] %vm297_vm0, %v403_v24 }
 0x10d   : > { %v428_v27 = vpop.xlane.xlu1 %427  ;;  %v415_v28 = vpop.xlane.xlu0 %414 }
 0x10e   : > { %v429_v29 = vadd.f32 %v428_v27, %v419_v25  ;;  %v416_v30 = vadd.f32 %v415_v28, %v406_v26 }
 0x110   : > { %430 = vst.msk [vmem:[#allocation4] sm:$0xf] %vm299_vm4, %v429_v29  ;;  %418 = vst.msk [vmem:[#allocation3] sm:$0xf] %vm299_vm4, %v416_v30 }
 0x113   : > { %v434_v0 = vld [vmem:[#allocation2] sm:$0x1] }
 0x114   : > { %435 = vst.msk [vmem:[%s284_s21] sm:$0x1] %vm297_vm0, %v434_v0 }
 0x117   : > { %v438_v31 = vld [vmem:[#allocation4] sm:$0xf]  ;;  %v436_v32 = vld [vmem:[#allocation3] sm:$0xf] }
 0x118   : > { %439 = vst.msk [vmem:[%s292_s7] sm:$0xf] %vm299_vm4, %v438_v31  ;;  %437 = vst.msk [vmem:[%s288_s6] sm:$0xf] %vm299_vm4, %v436_v32 }
 0x119 PF: > { %s21_s20 = sadd.s32 1, %s801_s20   ;;  %s998_s15 = smov %s785_s16 }
 0x11a   : > { %p18_p9 = scmp.ge.s32.totalorder %s21_s20, 4   ;;  %s999_s16 = smov %s789_s17 }
 0x11b   : > { %s1000_s17 = smov %s880_s27  ;;  %s1001_s18 = smov %s797_s19 }
 0x11c   : > { %s1002_s19 = smov %s1004_s22  ;;  %20 = sbr.rel (!%p18_p9) target bundleno = 6 (0x6), region = 113 }
 0x121   :  { %485 = vsyncpa [#allocation6], 1 }
 0x122   :  { %487 = vsyncpa [#allocation6 + $0x1], 1 }
 0x123   :  { %488 = vsyncpa [#allocation8], 1 }
 0x124   :  { %490 = vsyncpa [#allocation8 + $0x1], 1 }

</bundles_post_ra>
